<compile_context>
chip_gen: v6e
topology: v6e:2x2x1
jax: 0.10.0
libtpu: 0.0.40
codegen_flags: <defaults>
</compile_context>

<pallas_src>
import math
from functools import partial

import jax
import jax.numpy as jnp
from jax.experimental import pallas as pl
from jax.experimental.pallas import tpu as pltpu


def mha_kernel(q_ref, k_ref, v_ref, wq_ref, wk_ref, wv_ref, wfc_ref,
               ln_g_ref, ln_b_ref, out_ref, *attn_refs,
               n_head, d_k, d_v, compute_dtype):
    f32 = jnp.float32
    cd = compute_dtype

    q = q_ref[...].astype(f32)          # (tq, D)
    residual = q

    # ---- LayerNorm(q), eps=1e-6 (f32 VPU/EUP math) ----
    mean = jnp.mean(q, axis=-1, keepdims=True)
    var = jnp.mean((q - mean) ** 2, axis=-1, keepdims=True)
    qn = (q - mean) * jax.lax.rsqrt(var + 1e-6)
    qn = qn * ln_g_ref[...].astype(f32) + ln_b_ref[...].astype(f32)

    # ---- Wide QKV projections: low-precision operands, f32 accumulation ----
    # (1/sqrt(d_k) already folded into wq by the wrapper.)
    Q = jnp.dot(qn.astype(cd), wq_ref[...], preferred_element_type=f32)   # (tq, H*dk)
    K = jnp.dot(k_ref[...], wk_ref[...], preferred_element_type=f32)      # (Lk, H*dk)
    V = jnp.dot(v_ref[...], wv_ref[...], preferred_element_type=f32)      # (Lk, H*dv)

    # ---- Head split: stack lane slices along a new leading head axis so the
    #      attention contractions run as single batched dots. ----
    Qh = jnp.stack([Q[:, h * d_k:(h + 1) * d_k] for h in range(n_head)], axis=0).astype(cd)
    Kh = jnp.stack([K[:, h * d_k:(h + 1) * d_k] for h in range(n_head)], axis=0).astype(cd)
    Vh = jnp.stack([V[:, h * d_v:(h + 1) * d_v] for h in range(n_head)], axis=0).astype(cd)

    # ---- Scores + softmax (f32) ----
    s = jnp.einsum("hqd,hkd->hqk", Qh, Kh, preferred_element_type=f32)    # (H, tq, Lk)
    s = s - jnp.max(s, axis=-1, keepdims=True)
    e = jnp.exp(s)
    denom = jnp.sum(e, axis=-1, keepdims=True)
    approx = jnp.dtype(cd) != jnp.dtype(jnp.float32)
    p = e * pl.reciprocal(denom, approx=approx)

    if attn_refs:  # only materialize attention probabilities if requested
        attn_refs[0][...] = p.astype(attn_refs[0].dtype)

    # ---- PV (batched over heads) ----
    o = jnp.einsum("hqk,hkd->hqd", p.astype(cd), Vh,
                   preferred_element_type=f32)                             # (H, tq, dv)

    # ---- Output projection: sum_h O_h @ Wfc_h  ==  concat_h(O_h) @ Wfc ----
    proj = jnp.einsum("hqd,hdD->hqD", o.astype(cd), wfc_ref[...],
                      preferred_element_type=f32)                          # (H, tq, D)
    out = jnp.sum(proj, axis=0) + residual
    out_ref[...] = out.astype(out_ref.dtype)


def _nbytes(shape, dtype):
    return math.prod(shape) * jnp.dtype(dtype).itemsize


def multi_head_attention(q, k, v, params, *, n_head, d_k, d_v,
                         compute_dtype=jnp.bfloat16, return_attn=True,
                         attn_dtype=jnp.bfloat16, block_q=None):
    """q, k, v: (B, L, d_model) float32.

    Returns (output (B, Lq, D) f32, attn (B, H, Lq, Lk) attn_dtype or None).
    """
    B, Lq, D = q.shape
    Lk = k.shape[1]
    assert v.shape[1] == Lk
    cd = jnp.dtype(compute_dtype)

    # PyTorch nn.Linear stores weight as (out, in); pre-transpose to (in, out).
    # The 1/sqrt(d_k) scale is folded into Wq (free, one-time).
    temperature = float(d_k) ** 0.5
    wq = (params["w_qs"].T * (1.0 / temperature)).astype(cd)      # (D, H*dk)
    wk = params["w_ks"].T.astype(cd)                              # (D, H*dk)
    wv = params["w_vs"].T.astype(cd)                              # (D, H*dv)
    wfc = params["fc"].T.reshape(n_head, d_v, D).astype(cd)       # (H, dv, D)
    ln_g = params["ln_gamma"].reshape(1, D).astype(jnp.float32)
    ln_b = params["ln_beta"].reshape(1, D).astype(jnp.float32)

    q_in = q.astype(jnp.float32)          # f32 needed for LayerNorm + residual
    k_in = k.astype(cd)                   # matmul-only operands: low precision
    v_in = v.astype(cd)

    # Query-tile selection: multiple of 8 (sublane) or the full extent.
    if block_q is None:
        block_q = min(Lq, 256)
    if Lq % block_q != 0 or block_q % 8 != 0:
        block_q = Lq
    grid = (B, Lq // block_q)

    kernel = partial(mha_kernel, n_head=n_head, d_k=d_k, d_v=d_v,
                     compute_dtype=cd)

    out_spec = pl.BlockSpec((pl.Squeezed(), block_q, D), lambda b, qi: (b, qi, 0))
    if return_attn:
        out_shape = (
            jax.ShapeDtypeStruct((B, Lq, D), jnp.float32),
            jax.ShapeDtypeStruct((B, n_head, Lq, Lk), jnp.dtype(attn_dtype)),
        )
        out_specs = [
            out_spec,
            pl.BlockSpec((pl.Squeezed(), n_head, block_q, Lk),
                         lambda b, qi: (b, 0, qi, 0)),
        ]
    else:
        out_shape = jax.ShapeDtypeStruct((B, Lq, D), jnp.float32)
        out_specs = out_spec

    # Explicit scoped-VMEM budget derived from the chosen tiling (double-buffered
    # I/O blocks + intermediate headroom), clamped to be safe on v7x's 64 MiB.
    io_bytes = (
        2 * _nbytes((block_q, D), jnp.float32)            # q block + out block
        + 2 * _nbytes((Lk, D), cd)                        # k, v blocks
        + 2 * _nbytes((D, n_head * d_k), cd)              # wq, wk
        + _nbytes((D, n_head * d_v), cd)                  # wv
        + _nbytes((n_head, d_v, D), cd)                   # fc weight
        + 2 * _nbytes((1, D), jnp.float32)                # ln gamma / beta
        + (_nbytes((n_head, block_q, Lk), attn_dtype) if return_attn else 0)
    )
    scratch_bytes = (
        4 * _nbytes((n_head, block_q, Lk), jnp.float32)
        + 3 * _nbytes((Lk, n_head * max(d_k, d_v)), jnp.float32)
        + 4 * _nbytes((block_q, D), jnp.float32)
    )
    vmem_limit = int(min(max(2 * io_bytes + scratch_bytes, 16 * 2 ** 20), 64 * 2 ** 20))

    # Note: weights have constant index maps so they are DMA'd only once across
    # the grid; pl.Buffered(1) could drop their second buffer on v7x but is
    # skipped here for portability.
    result = pl.pallas_call(
        kernel,
        out_shape=out_shape,
        grid_spec=pltpu.PrefetchScalarGridSpec(
            num_scalar_prefetch=0,
            grid=grid,
            in_specs=[
                pl.BlockSpec((pl.Squeezed(), block_q, D), lambda b, qi: (b, qi, 0)),
                pl.BlockSpec((pl.Squeezed(), Lk, D), lambda b, qi: (b, 0, 0)),
                pl.BlockSpec((pl.Squeezed(), Lk, D), lambda b, qi: (b, 0, 0)),
                pl.BlockSpec(wq.shape, lambda b, qi: (0, 0)),
                pl.BlockSpec(wk.shape, lambda b, qi: (0, 0)),
                pl.BlockSpec(wv.shape, lambda b, qi: (0, 0)),
                pl.BlockSpec(wfc.shape, lambda b, qi: (0, 0, 0)),
                pl.BlockSpec((1, D), lambda b, qi: (0, 0)),
                pl.BlockSpec((1, D), lambda b, qi: (0, 0)),
            ],
            out_specs=out_specs,
        ),
        compiler_params=pltpu.CompilerParams(
            dimension_semantics=("parallel", "parallel"),
            vmem_limit_bytes=vmem_limit,
        ),
    )(q_in, k_in, v_in, wq, wk, wv, wfc, ln_g, ln_b)

    if return_attn:
        out, attn = result
        return out, attn
    return result, None


def mha_reference(q, k, v, params, *, n_head, d_k, d_v):
    """Pure-JAX reference mirroring the PyTorch forward (eval mode, f32)."""
    B, Lq, D = q.shape
    Lk = k.shape[1]
    residual = q
    mean = jnp.mean(q, axis=-1, keepdims=True)
    var = jnp.mean((q - mean) ** 2, axis=-1, keepdims=True)
    qn = (q - mean) / jnp.sqrt(var + 1e-6) * params["ln_gamma"] + params["ln_beta"]
    Q = (qn @ params["w_qs"].T).reshape(B, Lq, n_head, d_k).transpose(0, 2, 1, 3)
    K = (k @ params["w_ks"].T).reshape(B, Lk, n_head, d_k).transpose(0, 2, 1, 3)
    V = (v @ params["w_vs"].T).reshape(B, Lk, n_head, d_v).transpose(0, 2, 1, 3)
    attn = jnp.einsum("bhqd,bhkd->bhqk", Q / (d_k ** 0.5), K)
    attn = jax.nn.softmax(attn, axis=-1)
    out = jnp.einsum("bhqk,bhkd->bhqd", attn, V)
    out = out.transpose(0, 2, 1, 3).reshape(B, Lq, n_head * d_v)
    out = out @ params["fc"].T + residual
    return out, attn


if __name__ == "__main__":
    # Small, module-consistent shapes.
    B, L, d_model = 2, 8, 32
    n_head, d_k, d_v = 4, 8, 8

    key = jax.random.PRNGKey(0)
    keys = jax.random.split(key, 8)
    q = jax.random.normal(keys[0], (B, L, d_model), dtype=jnp.float32)
    k = jax.random.normal(keys[1], (B, L, d_model), dtype=jnp.float32)
    v = jax.random.normal(keys[2], (B, L, d_model), dtype=jnp.float32)

    scale = 0.1
    params = {
        "w_qs": scale * jax.random.normal(keys[3], (n_head * d_k, d_model), jnp.float32),
        "w_ks": scale * jax.random.normal(keys[4], (n_head * d_k, d_model), jnp.float32),
        "w_vs": scale * jax.random.normal(keys[5], (n_head * d_v, d_model), jnp.float32),
        "fc":   scale * jax.random.normal(keys[6], (d_model, n_head * d_v), jnp.float32),
        "ln_gamma": jnp.ones((d_model,), jnp.float32),
        "ln_beta":  jnp.zeros((d_model,), jnp.float32),
    }

    out_ref, attn_ref = mha_reference(q, k, v, params, n_head=n_head, d_k=d_k, d_v=d_v)

    # 1) Full-precision compute path: strict numerical check vs. the reference.
    out32, attn32 = multi_head_attention(
        q, k, v, params, n_head=n_head, d_k=d_k, d_v=d_v,
        compute_dtype=jnp.float32, attn_dtype=jnp.float32)
    out32 = jax.block_until_ready(out32)
    attn32 = jax.block_until_ready(attn32)
    assert out32.shape == (B, L, d_model) and attn32.shape == (B, n_head, L, L)
    assert jnp.allclose(out32, out_ref, atol=1e-4, rtol=1e-4)
    assert jnp.allclose(attn32, attn_ref, atol=1e-4, rtol=1e-4)

    # 2) Default fast path: bf16 MXU operands with f32 accumulation (looser tol).
    out16, attn16 = multi_head_attention(
        q, k, v, params, n_head=n_head, d_k=d_k, d_v=d_v)
    out16 = jax.block_until_ready(out16)
    attn16 = jax.block_until_ready(attn16)
    assert out16.shape == (B, L, d_model) and attn16.shape == (B, n_head, L, L)
    assert jnp.allclose(out16, out_ref, atol=2e-2, rtol=2e-2)
    assert jnp.allclose(attn16.astype(jnp.float32), attn_ref, atol=2e-2, rtol=2e-2)

    # 3) Flash-style path: skip materializing attention probabilities to HBM.
    out_na, attn_na = multi_head_attention(
        q, k, v, params, n_head=n_head, d_k=d_k, d_v=d_v, return_attn=False)
    out_na = jax.block_until_ready(out_na)
    assert attn_na is None
    assert jnp.allclose(out_na, out_ref, atol=2e-2, rtol=2e-2)

    print("KERNEL_OK")
</pallas_src>

<mosaic_0001>
module attributes {stable_mosaic.version = 11 : i64} {
  func.func @mha_kernel(%arg0: i32, %arg1: i32, %arg2: memref<1x8x32xf32, #tpu.memory_space<vmem>>, %arg3: memref<1x8x32xf32, #tpu.memory_space<vmem>>, %arg4: memref<1x8x32xf32, #tpu.memory_space<vmem>>, %arg5: memref<32x32xf32, #tpu.memory_space<vmem>>, %arg6: memref<32x32xf32, #tpu.memory_space<vmem>>, %arg7: memref<32x32xf32, #tpu.memory_space<vmem>>, %arg8: memref<4x8x32xf32, #tpu.memory_space<vmem>>, %arg9: memref<1x32xf32, #tpu.memory_space<vmem>>, %arg10: memref<1x32xf32, #tpu.memory_space<vmem>>, %arg11: memref<1x8x32xf32, #tpu.memory_space<vmem>>, %arg12: memref<1x4x8x8xf32, #tpu.memory_space<vmem>>) attributes {dimension_semantics = [#tpu.dimension_semantics<parallel>, #tpu.dimension_semantics<parallel>], iteration_bounds = array<i64: 2, 1>, scalar_prefetch = 0 : i64, scratch_operands = 0 : i64, tpu.core_type = #tpu.core_type<tc>, window_params = [{transform_indices = @transform_0, window_bounds = array<i64: 1, 8, 32>}, {transform_indices = @transform_1, window_bounds = array<i64: 1, 8, 32>}, {transform_indices = @transform_2, window_bounds = array<i64: 1, 8, 32>}, {pipeline_mode = #tpu.pipeline_mode<synchronous>, transform_indices = @transform_3, window_bounds = array<i64: 32, 32>}, {pipeline_mode = #tpu.pipeline_mode<synchronous>, transform_indices = @transform_4, window_bounds = array<i64: 32, 32>}, {pipeline_mode = #tpu.pipeline_mode<synchronous>, transform_indices = @transform_5, window_bounds = array<i64: 32, 32>}, {pipeline_mode = #tpu.pipeline_mode<synchronous>, transform_indices = @transform_6, window_bounds = array<i64: 4, 8, 32>}, {pipeline_mode = #tpu.pipeline_mode<synchronous>, transform_indices = @transform_7, window_bounds = array<i64: 1, 32>}, {pipeline_mode = #tpu.pipeline_mode<synchronous>, transform_indices = @transform_8, window_bounds = array<i64: 1, 32>}, {transform_indices = @transform_9, window_bounds = array<i64: 1, 8, 32>}, {transform_indices = @transform_10, window_bounds = array<i64: 1, 4, 8, 8>}]} {
    %c0 = arith.constant 0 : index
    %c0_0 = arith.constant 0 : index
    %c0_1 = arith.constant 0 : index
    %0 = vector.load %arg2[%c0, %c0_0, %c0_1] : memref<1x8x32xf32, #tpu.memory_space<vmem>>, vector<1x8x32xf32>
    %1 = vector.shape_cast %0 : vector<1x8x32xf32> to vector<8x32xf32>
    %cst = arith.constant dense<0.000000e+00> : vector<8xf32>
    %2 = vector.multi_reduction <add>, %1, %cst [1] : vector<8x32xf32> to vector<8xf32>
    %3 = vector.shape_cast %2 : vector<8xf32> to vector<8x1xf32>
    %cst_2 = arith.constant 3.200000e+01 : f32
    %4 = vector.broadcast %cst_2 : f32 to vector<8x1xf32>
    %5 = arith.divf %3, %4 : vector<8x1xf32>
    %6 = vector.broadcast %5 : vector<8x1xf32> to vector<8x32xf32>
    %7 = arith.subf %1, %6 : vector<8x32xf32>
    %8 = arith.mulf %7, %7 : vector<8x32xf32>
    %cst_3 = arith.constant dense<0.000000e+00> : vector<8xf32>
    %9 = vector.multi_reduction <add>, %8, %cst_3 [1] : vector<8x32xf32> to vector<8xf32>
    %10 = vector.shape_cast %9 : vector<8xf32> to vector<8x1xf32>
    %cst_4 = arith.constant 3.200000e+01 : f32
    %11 = vector.broadcast %cst_4 : f32 to vector<8x1xf32>
    %12 = arith.divf %10, %11 : vector<8x1xf32>
    %13 = vector.broadcast %5 : vector<8x1xf32> to vector<8x32xf32>
    %14 = arith.subf %1, %13 : vector<8x32xf32>
    %cst_5 = arith.constant 9.99999997E-7 : f32
    %15 = vector.broadcast %cst_5 : f32 to vector<8x1xf32>
    %16 = arith.addf %12, %15 : vector<8x1xf32>
    %17 = math.rsqrt %16 : vector<8x1xf32>
    %18 = vector.broadcast %17 : vector<8x1xf32> to vector<8x32xf32>
    %19 = arith.mulf %14, %18 : vector<8x32xf32>
    %c0_6 = arith.constant 0 : index
    %c0_7 = arith.constant 0 : index
    %20 = vector.load %arg9[%c0_6, %c0_7] : memref<1x32xf32, #tpu.memory_space<vmem>>, vector<1x32xf32>
    %21 = vector.broadcast %20 : vector<1x32xf32> to vector<8x32xf32>
    %22 = arith.mulf %19, %21 : vector<8x32xf32>
    %c0_8 = arith.constant 0 : index
    %c0_9 = arith.constant 0 : index
    %23 = vector.load %arg10[%c0_8, %c0_9] : memref<1x32xf32, #tpu.memory_space<vmem>>, vector<1x32xf32>
    %24 = vector.broadcast %23 : vector<1x32xf32> to vector<8x32xf32>
    %25 = arith.addf %22, %24 : vector<8x32xf32>
    %c0_10 = arith.constant 0 : index
    %c0_11 = arith.constant 0 : index
    %26 = vector.load %arg5[%c0_10, %c0_11] : memref<32x32xf32, #tpu.memory_space<vmem>>, vector<32x32xf32>
    %cst_12 = arith.constant dense<0.000000e+00> : vector<8x32xf32>
    %27 = tpu.matmul %25, %26, %cst_12 {dimension_numbers = #tpu.dot_dimension_numbers<[1], [0], [0], [1], [0, 0, 1, 1], [], []>} : vector<8x32xf32>, vector<32x32xf32>, vector<8x32xf32> -> vector<8x32xf32>
    %c0_13 = arith.constant 0 : index
    %c0_14 = arith.constant 0 : index
    %c0_15 = arith.constant 0 : index
    %28 = vector.load %arg3[%c0_13, %c0_14, %c0_15] : memref<1x8x32xf32, #tpu.memory_space<vmem>>, vector<1x8x32xf32>
    %29 = vector.shape_cast %28 : vector<1x8x32xf32> to vector<8x32xf32>
    %c0_16 = arith.constant 0 : index
    %c0_17 = arith.constant 0 : index
    %30 = vector.load %arg6[%c0_16, %c0_17] : memref<32x32xf32, #tpu.memory_space<vmem>>, vector<32x32xf32>
    %cst_18 = arith.constant dense<0.000000e+00> : vector<8x32xf32>
    %31 = tpu.matmul %29, %30, %cst_18 {dimension_numbers = #tpu.dot_dimension_numbers<[1], [0], [0], [1], [0, 0, 1, 1], [], []>} : vector<8x32xf32>, vector<32x32xf32>, vector<8x32xf32> -> vector<8x32xf32>
    %c0_19 = arith.constant 0 : index
    %c0_20 = arith.constant 0 : index
    %c0_21 = arith.constant 0 : index
    %32 = vector.load %arg4[%c0_19, %c0_20, %c0_21] : memref<1x8x32xf32, #tpu.memory_space<vmem>>, vector<1x8x32xf32>
    %33 = vector.shape_cast %32 : vector<1x8x32xf32> to vector<8x32xf32>
    %c0_22 = arith.constant 0 : index
    %c0_23 = arith.constant 0 : index
    %34 = vector.load %arg7[%c0_22, %c0_23] : memref<32x32xf32, #tpu.memory_space<vmem>>, vector<32x32xf32>
    %cst_24 = arith.constant dense<0.000000e+00> : vector<8x32xf32>
    %35 = tpu.matmul %33, %34, %cst_24 {dimension_numbers = #tpu.dot_dimension_numbers<[1], [0], [0], [1], [0, 0, 1, 1], [], []>} : vector<8x32xf32>, vector<32x32xf32>, vector<8x32xf32> -> vector<8x32xf32>
    %36 = vector.extract_strided_slice %27 {offsets = [0, 0], sizes = [8, 8], strides = [1, 1]} : vector<8x32xf32> to vector<8x8xf32>
    %37 = vector.extract_strided_slice %27 {offsets = [0, 8], sizes = [8, 8], strides = [1, 1]} : vector<8x32xf32> to vector<8x8xf32>
    %38 = vector.extract_strided_slice %27 {offsets = [0, 16], sizes = [8, 8], strides = [1, 1]} : vector<8x32xf32> to vector<8x8xf32>
    %39 = vector.extract_strided_slice %27 {offsets = [0, 24], sizes = [8, 8], strides = [1, 1]} : vector<8x32xf32> to vector<8x8xf32>
    %40 = vector.shape_cast %36 : vector<8x8xf32> to vector<1x8x8xf32>
    %41 = vector.shape_cast %37 : vector<8x8xf32> to vector<1x8x8xf32>
    %42 = vector.shape_cast %38 : vector<8x8xf32> to vector<1x8x8xf32>
    %43 = vector.shape_cast %39 : vector<8x8xf32> to vector<1x8x8xf32>
    %44 = tpu.concatenate %40, %41, %42, %43 in 0 : vector<1x8x8xf32>, vector<1x8x8xf32>, vector<1x8x8xf32>, vector<1x8x8xf32> -> vector<4x8x8xf32>
    %45 = vector.extract_strided_slice %31 {offsets = [0, 0], sizes = [8, 8], strides = [1, 1]} : vector<8x32xf32> to vector<8x8xf32>
    %46 = vector.extract_strided_slice %31 {offsets = [0, 8], sizes = [8, 8], strides = [1, 1]} : vector<8x32xf32> to vector<8x8xf32>
    %47 = vector.extract_strided_slice %31 {offsets = [0, 16], sizes = [8, 8], strides = [1, 1]} : vector<8x32xf32> to vector<8x8xf32>
    %48 = vector.extract_strided_slice %31 {offsets = [0, 24], sizes = [8, 8], strides = [1, 1]} : vector<8x32xf32> to vector<8x8xf32>
    %49 = vector.shape_cast %45 : vector<8x8xf32> to vector<1x8x8xf32>
    %50 = vector.shape_cast %46 : vector<8x8xf32> to vector<1x8x8xf32>
    %51 = vector.shape_cast %47 : vector<8x8xf32> to vector<1x8x8xf32>
    %52 = vector.shape_cast %48 : vector<8x8xf32> to vector<1x8x8xf32>
    %53 = tpu.concatenate %49, %50, %51, %52 in 0 : vector<1x8x8xf32>, vector<1x8x8xf32>, vector<1x8x8xf32>, vector<1x8x8xf32> -> vector<4x8x8xf32>
    %54 = vector.extract_strided_slice %35 {offsets = [0, 0], sizes = [8, 8], strides = [1, 1]} : vector<8x32xf32> to vector<8x8xf32>
    %55 = vector.extract_strided_slice %35 {offsets = [0, 8], sizes = [8, 8], strides = [1, 1]} : vector<8x32xf32> to vector<8x8xf32>
    %56 = vector.extract_strided_slice %35 {offsets = [0, 16], sizes = [8, 8], strides = [1, 1]} : vector<8x32xf32> to vector<8x8xf32>
    %57 = vector.extract_strided_slice %35 {offsets = [0, 24], sizes = [8, 8], strides = [1, 1]} : vector<8x32xf32> to vector<8x8xf32>
    %58 = vector.shape_cast %54 : vector<8x8xf32> to vector<1x8x8xf32>
    %59 = vector.shape_cast %55 : vector<8x8xf32> to vector<1x8x8xf32>
    %60 = vector.shape_cast %56 : vector<8x8xf32> to vector<1x8x8xf32>
    %61 = vector.shape_cast %57 : vector<8x8xf32> to vector<1x8x8xf32>
    %62 = tpu.concatenate %58, %59, %60, %61 in 0 : vector<1x8x8xf32>, vector<1x8x8xf32>, vector<1x8x8xf32>, vector<1x8x8xf32> -> vector<4x8x8xf32>
    "tpu.trace_start"() <{level = 10 : i32, message = "hqd,hkd->hqk"}> : () -> ()
    %cst_25 = arith.constant dense<0.000000e+00> : vector<4x8x8xf32>
    %63 = tpu.matmul %44, %53, %cst_25 {dimension_numbers = #tpu.dot_dimension_numbers<[2], [2], [1], [1], [0, 0, 0, 1, 1, 1], [0], [0]>} : vector<4x8x8xf32>, vector<4x8x8xf32>, vector<4x8x8xf32> -> vector<4x8x8xf32>
    "tpu.trace_stop"() : () -> ()
    %cst_26 = arith.constant dense<0xFF800000> : vector<4x8xf32>
    %64 = vector.multi_reduction <maximumf>, %63, %cst_26 [2] : vector<4x8x8xf32> to vector<4x8xf32>
    %65 = vector.shape_cast %64 : vector<4x8xf32> to vector<4x8x1xf32>
    %66 = vector.broadcast %65 : vector<4x8x1xf32> to vector<4x8x8xf32>
    %67 = arith.subf %63, %66 : vector<4x8x8xf32>
    %68 = math.exp %67 : vector<4x8x8xf32>
    %cst_27 = arith.constant dense<0.000000e+00> : vector<4x8xf32>
    %69 = vector.multi_reduction <add>, %68, %cst_27 [2] : vector<4x8x8xf32> to vector<4x8xf32>
    %70 = vector.shape_cast %69 : vector<4x8xf32> to vector<4x8x1xf32>
    %71 = tpu.reciprocal %70 : vector<4x8x1xf32> -> vector<4x8x1xf32>
    %72 = vector.broadcast %71 : vector<4x8x1xf32> to vector<4x8x8xf32>
    %73 = arith.mulf %68, %72 : vector<4x8x8xf32>
    %c0_28 = arith.constant 0 : index
    %c0_29 = arith.constant 0 : index
    %c0_30 = arith.constant 0 : index
    %c0_31 = arith.constant 0 : index
    %74 = vector.load %arg12[%c0_28, %c0_29, %c0_30, %c0_31] : memref<1x4x8x8xf32, #tpu.memory_space<vmem>>, vector<1x4x8x8xf32>
    %75 = vector.shape_cast %74 : vector<1x4x8x8xf32> to vector<4x8x8xf32>
    %76 = vector.shape_cast %73 : vector<4x8x8xf32> to vector<1x4x8x8xf32>
    tpu.vector_store %arg12[%c0_28, %c0_29, %c0_30, %c0_31], %76 {strides = array<i32>} : memref<1x4x8x8xf32, #tpu.memory_space<vmem>>, vector<1x4x8x8xf32>,
    "tpu.trace_start"() <{level = 10 : i32, message = "hqk,hkd->hqd"}> : () -> ()
    %cst_32 = arith.constant dense<0.000000e+00> : vector<4x8x8xf32>
    %77 = tpu.matmul %73, %62, %cst_32 {dimension_numbers = #tpu.dot_dimension_numbers<[2], [1], [1], [2], [0, 0, 0, 1, 1, 2], [0], [0]>} : vector<4x8x8xf32>, vector<4x8x8xf32>, vector<4x8x8xf32> -> vector<4x8x8xf32>
    "tpu.trace_stop"() : () -> ()
    %c0_33 = arith.constant 0 : index
    %c0_34 = arith.constant 0 : index
    %c0_35 = arith.constant 0 : index
    %78 = vector.load %arg8[%c0_33, %c0_34, %c0_35] : memref<4x8x32xf32, #tpu.memory_space<vmem>>, vector<4x8x32xf32>
    "tpu.trace_start"() <{level = 10 : i32, message = "hqd,hdD->hqD"}> : () -> ()
    %cst_36 = arith.constant dense<0.000000e+00> : vector<4x8x32xf32>
    %79 = tpu.matmul %77, %78, %cst_36 {dimension_numbers = #tpu.dot_dimension_numbers<[2], [1], [1], [2], [0, 0, 0, 1, 1, 2], [0], [0]>} : vector<4x8x8xf32>, vector<4x8x32xf32>, vector<4x8x32xf32> -> vector<4x8x32xf32>
    "tpu.trace_stop"() : () -> ()
    %cst_37 = arith.constant dense<0.000000e+00> : vector<8x32xf32>
    %80 = vector.multi_reduction <add>, %79, %cst_37 [0] : vector<4x8x32xf32> to vector<8x32xf32>
    %81 = arith.addf %80, %1 : vector<8x32xf32>
    %c0_38 = arith.constant 0 : index
    %c0_39 = arith.constant 0 : index
    %c0_40 = arith.constant 0 : index
    %82 = vector.load %arg11[%c0_38, %c0_39, %c0_40] : memref<1x8x32xf32, #tpu.memory_space<vmem>>, vector<1x8x32xf32>
    %83 = vector.shape_cast %82 : vector<1x8x32xf32> to vector<8x32xf32>
    %84 = vector.shape_cast %81 : vector<8x32xf32> to vector<1x8x32xf32>
    tpu.vector_store %arg11[%c0_38, %c0_39, %c0_40], %84 {strides = array<i32>} : memref<1x8x32xf32, #tpu.memory_space<vmem>>, vector<1x8x32xf32>,
    return
  }
  func.func @transform_0(%arg0: i32, %arg1: i32) -> (i32, i32, i32) {
    %c0_i32 = arith.constant 0 : i32
    %c0_i32_0 = arith.constant 0 : i32
    return %arg0, %arg1, %c0_i32 : i32, i32, i32
  }
  func.func @transform_1(%arg0: i32, %arg1: i32) -> (i32, i32, i32) {
    %c0_i32 = arith.constant 0 : i32
    %c0_i32_0 = arith.constant 0 : i32
    %c0_i32_1 = arith.constant 0 : i32
    return %arg0, %c0_i32, %c0_i32_0 : i32, i32, i32
  }
  func.func @transform_2(%arg0: i32, %arg1: i32) -> (i32, i32, i32) {
    %c0_i32 = arith.constant 0 : i32
    %c0_i32_0 = arith.constant 0 : i32
    %c0_i32_1 = arith.constant 0 : i32
    return %arg0, %c0_i32, %c0_i32_0 : i32, i32, i32
  }
  func.func @transform_3(%arg0: i32, %arg1: i32) -> (i32, i32) {
    %c0_i32 = arith.constant 0 : i32
    %c0_i32_0 = arith.constant 0 : i32
    %c0_i32_1 = arith.constant 0 : i32
    return %c0_i32, %c0_i32_0 : i32, i32
  }
  func.func @transform_4(%arg0: i32, %arg1: i32) -> (i32, i32) {
    %c0_i32 = arith.constant 0 : i32
    %c0_i32_0 = arith.constant 0 : i32
    %c0_i32_1 = arith.constant 0 : i32
    return %c0_i32, %c0_i32_0 : i32, i32
  }
  func.func @transform_5(%arg0: i32, %arg1: i32) -> (i32, i32) {
    %c0_i32 = arith.constant 0 : i32
    %c0_i32_0 = arith.constant 0 : i32
    %c0_i32_1 = arith.constant 0 : i32
    return %c0_i32, %c0_i32_0 : i32, i32
  }
  func.func @transform_6(%arg0: i32, %arg1: i32) -> (i32, i32, i32) {
    %c0_i32 = arith.constant 0 : i32
    %c0_i32_0 = arith.constant 0 : i32
    %c0_i32_1 = arith.constant 0 : i32
    %c0_i32_2 = arith.constant 0 : i32
    return %c0_i32, %c0_i32_0, %c0_i32_1 : i32, i32, i32
  }
  func.func @transform_7(%arg0: i32, %arg1: i32) -> (i32, i32) {
    %c0_i32 = arith.constant 0 : i32
    %c0_i32_0 = arith.constant 0 : i32
    %c0_i32_1 = arith.constant 0 : i32
    return %c0_i32, %c0_i32_0 : i32, i32
  }
  func.func @transform_8(%arg0: i32, %arg1: i32) -> (i32, i32) {
    %c0_i32 = arith.constant 0 : i32
    %c0_i32_0 = arith.constant 0 : i32
    %c0_i32_1 = arith.constant 0 : i32
    return %c0_i32, %c0_i32_0 : i32, i32
  }
  func.func @transform_9(%arg0: i32, %arg1: i32) -> (i32, i32, i32) {
    %c0_i32 = arith.constant 0 : i32
    %c0_i32_0 = arith.constant 0 : i32
    return %arg0, %arg1, %c0_i32 : i32, i32, i32
  }
  func.func @transform_10(%arg0: i32, %arg1: i32) -> (i32, i32, i32, i32) {
    %c0_i32 = arith.constant 0 : i32
    %c0_i32_0 = arith.constant 0 : i32
    %c0_i32_1 = arith.constant 0 : i32
    return %arg0, %c0_i32, %arg1, %c0_i32_0 : i32, i32, i32, i32
  }
}

</mosaic_0001>

<bundles_post_ra>
// kernel: tpu_custom_call.1
= control target key start
LH: loop header
LB: loop body
LE: loop exit
PB: predicated region body
PF: predicated region fallthrough
CT: control target
= control target key end

     0   :  { %s3131_s0 = inlined_call_operand.hbm [shape: f32[2,8,32], index: 0, kind: input, shape index: {}]   ;;  %s3132_s1 = inlined_call_operand.hbm [shape: f32[2,8,32], index: 1, kind: input, shape index: {}]   ;;  %s3133_s2 = inlined_call_operand.hbm [shape: f32[2,8,32], index: 2, kind: input, shape index: {}]   ;;  %s3134_s3 = inlined_call_operand.hbm [shape: f32[32,32], index: 3, kind: input, shape index: {}]   ;;  %s3135_s4 = inlined_call_operand.hbm [shape: f32[32,32], index: 4, kind: input, shape index: {}]   ;;  %s3136_s5 = inlined_call_operand.hbm [shape: f32[32,32], index: 5, kind: input, shape index: {}]   ;;  %s3137_s6 = inlined_call_operand.hbm [shape: f32[4,8,32], index: 6, kind: input, shape index: {}]   ;;  %s3138_s7 = inlined_call_operand.vmem [shape: f32[1,32], index: 7, kind: input, shape index: {}]   ;;  %s3139_s8 = inlined_call_operand.vmem [shape: f32[1,32], index: 8, kind: input, shape index: {}]   ;;  %s3140_s9 = inlined_call_operand.hbm [shape: f32[2,8,32], index: 9, kind: output, shape index: {0}]   ;;  %s3141_s10 = inlined_call_operand.hbm [shape: f32[2,4,8,8], index: 10, kind: output, shape index: {1}]  }
   0x1   :  { %3159 = sst [smem:[#allocation29_spill]] %s3132_s1 }
   0x2   :  { %3160 = sst [smem:[#allocation30_spill]] %s3134_s3 }
   0x3   :  { %3161 = sst [smem:[#allocation31_spill]] %s3135_s4 }
   0x4   :  { %3162 = sst [smem:[#allocation32_spill]] %s3136_s5 }
   0x5   :  { %3163 = sst [smem:[#allocation33_spill]] %s3140_s9 }
   0x6   :  { %3164 = sst [smem:[#allocation34_spill]] %s3141_s10 }
   0x7   :  { %16 = vsyncpa [#allocation3], 0 }
   0x8   :  { %18 = vsyncpa [#allocation3 + $0x1], 0 }
   0x9   :  { %19 = vsyncpa [#allocation6], 0 }
   0xa   :  { %21 = vsyncpa [#allocation6 + $0x1], 0 }
   0xb   :  { %22 = vsyncpa [#allocation9], 0 }
   0xc   :  { %23 = vsyncpa [#allocation12], 0 }
   0xd   :  { %24 = vsyncpa [#allocation4], 0 }
   0xe   :  { %26 = vsyncpa [#allocation4 + $0x1], 0 }
   0xf   :  { %27 = vsyncpa [#allocation16], 0 }
  0x10   :  { %29 = vsyncpa [#allocation16 + $0x1], 0  ;;  %s2712_s13 = smov 0   ;;  %s2714_s14 = smov 0  }
  0x11   :  { %s2716_s15 = smov 0   ;;  %s2718_s16 = smov 0  }
  0x12   :  { %s2720_s17 = smov 0   ;;  %s2722_s18 = smov 0  }
  0x13 LB: > { %3165 = sst [smem:[#allocation23_spill]] %s2617_s13  ;;  %s2743_s19 = sadd.s32 4294967295, %s2637_s18   ;;  %s2637_s18 = sphi %s2722_s18, %s35_s18   ;;  %s2633_s17 = sphi %s2720_s17, %s3203_s17   ;;  %s2629_s16 = sphi %s2718_s16, %s3202_s16   ;;  %s2625_s15 = sphi %s2716_s15, %s3206_s15   ;;  %s2621_s14 = sphi %s2714_s14, %s3205_s14   ;;  %s2617_s13 = sphi %s2712_s13, %s3204_s13  }
  0x14   : > { %3166 = sst [smem:[#allocation24_spill]] %s2633_s17  ;;  %p1999_p0 = scmp.ge.s32.totalorder %s2637_s18, 1 }
  0x15   : > { %3167 = sst [smem:[#allocation25_spill]] %s2637_s18  ;;  %p3153_p1 = scmp.eq.s32.totalorder %s2743_s19, 0 }
  0x16   : > { %p314_p2 = scmp.lt.s32.totalorder %s2637_s18, 3  ;;  %s2639_s21 = smov [#allocation8]  }
  0x17   : > { %s326_s22 = sshll.u32 %s2639_s21, 4  ;;  %s2640_s24 = smov [#allocation11]   ;;  %s327_s22 = int_to_ptr.vmem [resolvable:$true] %s326_s22 }
  0x18   : > { %p2748_p3 = pnand %p1999_p0, %p314_p2  ;;  %s352_s25 = sshll.u32 %s2640_s24, 4  ;;  %s353_s25 = int_to_ptr.vmem [resolvable:$true] %s352_s25 }
  0x19   : > { %s2338_s26 = scalar_lea.vmem %s327_s22, 512  ;;  %p2346_p11 = scmp.lt.s32.totalorder %s327_s22, %s327_s22 }
  0x1a   : > { %p2208_p4 = pneg %p2748_p3  ;;  %p2339_p8 = scmp.ne.s32.totalorder %s327_s22, %s2338_s26 }
  0x1b   : > { %p2347_p12 = scmp.lt.s32.totalorder %s2338_s26, %s2338_s26 }
  0x1c   : > { %p2757_p6 = pnand %p2208_p4, %p3153_p1 }
  0x1d   : > { %p2348_p13 = por %p2347_p12, %p2346_p11 }
  0x1e   : > { %p3154_p7 = pneg %p2757_p6 }
  0x20   : > { %p2341_p9 = pnand %p2339_p8, %p3154_p7 }
  0x22   : > { %p2342_p10 = pneg %p2341_p9 }
  0x24   : > { %p2349_p0 = pnand %p2348_p13, %p2342_p10 }
  0x26   : > { %2352 = shalt.err (!%p2349_p0)
}
  0x27   : > { %s3142_s27 = smov 128   ;;  %s3144_s28 = smov 8  }
  0x28   : > { %s3170_s3 = sld [smem:[#allocation30_spill]]  ;;  %s2364_s11 = scalar_lea.vmem %s353_s25, 512 }
  0x29   : > { %p2365_p2 = scmp.ne.s32.totalorder %s353_s25, %s2364_s11  ;;  %p2372_p9 = scmp.lt.s32.totalorder %s353_s25, %s353_s25 }
  0x2a   : > { %p2373_p10 = scmp.lt.s32.totalorder %s2364_s11, %s2364_s11 }
  0x2b   : > { %p2367_p4 = pnand %p2365_p2, %p3154_p7 }
  0x2c   : > { %p2374_p11 = por %p2373_p10, %p2372_p9 }
  0x2d   : > { %p2368_p8 = pneg %p2367_p4 }
  0x2e   : > { %2211 = dma.hbm_to_vmem [thread:$0]  (!%p2757_p6), %s3170_s3, 512, %s327_s22, [#allocation9], %s3142_s27, %s3142_s27, %s3144_s28  }
  0x2f   : > { %p2375_p12 = pnand %p2374_p11, %p2368_p8 }
  0x31   : > { %2378 = shalt.err (!%p2375_p12)
}
  0x32   : > { %s3171_s5 = sld [smem:[#allocation32_spill]]  ;;  %s1998_s22 = sadd.s32 4294967294, %s2637_s18  }
  0x33   : > { %s47_s24 = sadd.s32 1, %s2633_s17  ;;  %s56_s26 = sadd.s32 1, %s2625_s15 }
  0x34   : > { %p49_p13 = scmp.ge.s32.totalorder %s47_s24, 2  ;;  %p63_p0 = scmp.ne.s32.totalorder %s2625_s15, %s2621_s14 }
  0x35   : > { %p64_p2 = scmp.eq.s32.totalorder %s2637_s18, 0  ;;  %p69_p8 = scmp.ne.s32.totalorder %s2621_s14, %s2617_s13 }
  0x36   : > { %s3208_s24 = smov (%p49_p13, %s47_s24), 0  ;;  %p273_p9 = scmp.eq.s32.totalorder %s2743_s19, 1 }
  0x37   : > { %3172 = sst [smem:[#allocation26_spill]] %s3208_s24  ;;  %p2793_p4 = por %p64_p2, %p63_p0 }
  0x38   : > { %2217 = dma.hbm_to_vmem [thread:$0]  (!%p2757_p6), %s3171_s5, 512, %s353_s25, [#allocation12], %s3142_s27, %s3142_s27, %s3144_s28  }
  0x39   : > { %s51_s25 = ssub.s32 %s2633_s17, %s3208_s24  ;;  %p2804_p11 = por %p3153_p1, %p69_p8 }
  0x3a   : > { %p54_p10 = scmp.eq.s32.totalorder %s51_s25, 0  ;;  %p2808_p12 = por %p273_p9, %p63_p0 }
  0x3b   : > { %p279_p13 = scmp.eq.s32.totalorder %s1998_s22, 1  ;;  %p2242_p5 = scmp.lt.s32.totalorder %s2637_s18, 2 }
  0x3c   : > { %s3175_s11 = scalar_select %p2808_p12, 1, 0 }
  0x3d   : > { %s2813_s12 = scalar_select %p54_p10, %s2625_s15, %s56_s26  }
  0x3e   : > { %p2815_p2 = por %p279_p13, %p69_p8  ;;  %s3149_s27 = sand.u32 1, %s2625_s15  }
  0x3f   : > { %3176 = sst [smem:[#allocation27_spill]] %s2813_s12  ;;  %s2822_s28 = sshll.u32 %s2633_s17, 7 }
  0x40   : > { %s3177_s21 = scalar_select %p2815_p2, 1, 0 }
  0x41   : > { %s2826_s25 = sshll.u32 %s3149_s27, 3  ;;  %p2830_p0 = pnand %p2242_p5, %p2793_p4 }
  0x42   : > { %3178 = sst [smem:[#allocation28_spill]] %s3177_s21  ;;  %s404_s22 = sand.u32 1, %s2637_s18  }
  0x43   : > { %s3180_s1 = sld [smem:[#allocation29_spill]]  ;;  %s408_s12 = scalar_lea.vmem [#allocation5], %s2826_s25 }
  0x44   : > { %s415_s17 = sshll.u32 %s408_s12, 4  ;;  %s2840_s21 = scalar_lea.sflag [#allocation6], %s404_s22  ;;  %s416_s17 = int_to_ptr.vmem [resolvable:$true] %s415_s17 }
  0x45   : > { %p3155_p8 = pneg %p2830_p0  ;;  %s2392_s29 = scalar_lea.vmem %s416_s17, 128 }
  0x46   : > { %p2393_p9 = scmp.ne.s32.totalorder %s416_s17, %s2392_s29  ;;  %s2643_s27 = smov [#allocation5]  }
  0x47   : > { %s2397_s13 = sshll.u32 %s2643_s27, 4  ;;  %s2398_s13 = int_to_ptr.vmem [resolvable:$false] %s2397_s13 }
  0x48   : > { %p2395_p5 = pnand %p2393_p9, %p3155_p8  ;;  %s2399_s18 = scalar_lea.vmem %s2398_s13, 256 }
  0x49   : > { %s413_s24 = scalar_lea.hbm %s3180_s1, %s2822_s28  ;;  %p2400_p10 = scmp.lt.s32.totalorder %s416_s17, %s2398_s13 }
  0x4a   : > { %p2396_p4 = pneg %p2395_p5  ;;  %p2401_p13 = scmp.lt.s32.totalorder %s2399_s18, %s2392_s29 }
  0x4c   : > { %p2402_p1 = por %p2401_p13, %p2400_p10 }
  0x4e   : > { %p2403_p7 = pnand %p2402_p1, %p2396_p4 }
  0x50   : > { %2406 = shalt.err (!%p2403_p7)
}
  0x51   : > { %2227 = dma.hbm_to_vmem [thread:$0]  (!%p2830_p0), %s413_s24, 128, %s416_s17, %s2840_s21  }
  0x52   : > { %s2644_s5 = smov [#allocation10]   ;;  %s2645_s22 = smov [#allocation13]  }
  0x53   : > { %s339_s12 = sshll.u32 %s2644_s5, 4  ;;  %s365_s26 = sshll.u32 %s2645_s22, 4  ;;  %s340_s12 = int_to_ptr.vmem [resolvable:$true] %s339_s12  ;;  %s366_s26 = int_to_ptr.vmem [resolvable:$true] %s365_s26 }
  0x54   : > { %s2418_s1 = scalar_lea.vmem %s340_s12, 512  ;;  %p3181_p5 = pneg %p2757_p6 }
  0x55   : > { %p2419_p9 = scmp.ne.s32.totalorder %s340_s12, %s2418_s1  ;;  %p2426_p12 = scmp.lt.s32.totalorder %s340_s12, %s340_s12 }
  0x56   : > { %p2427_p10 = scmp.lt.s32.totalorder %s2418_s1, %s2418_s1 }
  0x57   : > { %p2421_p8 = pnand %p2419_p9, %p3181_p5 }
  0x58   : > { %p2428_p1 = por %p2427_p10, %p2426_p12 }
  0x59   : > { %p2422_p2 = pneg %p2421_p8 }
  0x5b   : > { %p2429_p7 = pnand %p2428_p1, %p2422_p2 }
  0x5d   : > { %2432 = shalt.err (!%p2429_p7)
}
  0x5e   : > { %s3182_s13 = smov 8   ;;  %s3183_s17 = smov 128  }
  0x5f   : > { %s3184_s4 = sld [smem:[#allocation31_spill]]  ;;  %s2444_s24 = scalar_lea.vmem %s366_s26, 512 }
  0x60   : > { %p2445_p4 = scmp.ne.s32.totalorder %s366_s26, %s2444_s24  ;;  %p3185_p8 = pmov %p3181_p5 }
  0x61   : > { %p2452_p12 = scmp.lt.s32.totalorder %s366_s26, %s366_s26  ;;  %p2453_p2 = scmp.lt.s32.totalorder %s2444_s24, %s2444_s24 }
  0x62   : > { %p2447_p13 = pnand %p2445_p4, %p3185_p8 }
  0x63   : > { %p2454_p5 = por %p2453_p2, %p2452_p12 }
  0x64   : > { %p2448_p9 = pneg %p2447_p13 }
  0x65   : > { %2214 = dma.hbm_to_vmem [thread:$0]  (!%p2757_p6), %s3184_s4, 512, %s340_s12, [#allocation9], %s3183_s17, %s3183_s17, %s3182_s13  }
  0x66   : > { %p2455_p10 = pnand %p2454_p5, %p2448_p9 }
  0x68   : > { %2458 = shalt.err (!%p2455_p10)
}
  0x69   : > { %2220 = dma.hbm_to_vmem [thread:$0]  (!%p2757_p6), %s3137_s6, 512, %s366_s26, [#allocation12], %s3183_s17, %s3183_s17, %s3182_s13  }
  0x6a   : > { %s395_s22 = scalar_lea.hbm %s3131_s0, %s2822_s28  ;;  %s389_s18 = scalar_lea.vmem [#allocation2], %s2826_s25 }
  0x6b   : > { %s397_s27 = sshll.u32 %s389_s18, 4  ;;  %s431_s4 = scalar_lea.hbm %s3133_s2, %s2822_s28  ;;  %s398_s27 = int_to_ptr.vmem [resolvable:$true] %s397_s27 }
  0x6c   : > { %s3186_s9 = sand.u32 1, %s2625_s15   ;;  %s2472_s1 = scalar_lea.vmem %s398_s27, 128 }
  0x6d   : > { %s386_s10 = scalar_lea.sflag [#allocation3], %s3186_s9  ;;  %p2473_p1 = scmp.ne.s32.totalorder %s398_s27, %s2472_s1 }
  0x6e   : > { %p3187_p7 = pneg %p2830_p0  ;;  %s2646_s26 = smov [#allocation2]  }
  0x6f   : > { %s2477_s13 = sshll.u32 %s2646_s26, 4  ;;  %s2478_s13 = int_to_ptr.vmem [resolvable:$false] %s2477_s13 }
  0x70   : > { %p2475_p4 = pnand %p2473_p1, %p3187_p7  ;;  %s2479_s17 = scalar_lea.vmem %s2478_s13, 256 }
  0x71   : > { %p2480_p6 = scmp.lt.s32.totalorder %s398_s27, %s2478_s13  ;;  %p2481_p13 = scmp.lt.s32.totalorder %s2479_s17, %s2472_s1 }
  0x72   : > { %p2476_p8 = pneg %p2475_p4 }
  0x73   : > { %p2482_p9 = por %p2481_p13, %p2480_p6 }
  0x75   : > { %p2483_p12 = pnand %p2482_p9, %p2476_p8 }
  0x77   : > { %2486 = shalt.err (!%p2483_p12)
}
  0x78   : > { %2224 = dma.hbm_to_vmem [thread:$0]  (!%p2830_p0), %s395_s22, 128, %s398_s27, %s386_s10  }
  0x79   : > { %s426_s9 = scalar_lea.vmem [#allocation7], %s2826_s25  ;;  %p3188_p5 = pmov %p3187_p7 }
  0x7a   : > { %s433_s29 = sshll.u32 %s426_s9, 4  ;;  %s2647_s12 = smov [#allocation7]   ;;  %s434_s29 = int_to_ptr.vmem [resolvable:$true] %s433_s29 }
  0x7b   : > { %s2500_s5 = scalar_lea.vmem %s434_s29, 128  ;;  %s2505_s18 = sshll.u32 %s2647_s12, 4  ;;  %s2506_s18 = int_to_ptr.vmem [resolvable:$false] %s2505_s18 }
  0x7c   : > { %p2501_p2 = scmp.ne.s32.totalorder %s434_s29, %s2500_s5  ;;  %s2507_s23 = scalar_lea.vmem %s2506_s18, 256 }
  0x7d   : > { %p2508_p7 = scmp.lt.s32.totalorder %s434_s29, %s2506_s18  ;;  %p2509_p4 = scmp.lt.s32.totalorder %s2507_s23, %s2500_s5 }
  0x7e   : > { %p2503_p10 = pnand %p2501_p2, %p3188_p5 }
  0x7f   : > { %p2510_p8 = por %p2509_p4, %p2508_p7 }
  0x80   : > { %p2504_p1 = pneg %p2503_p10 }
  0x82   : > { %p2511_p6 = pnand %p2510_p8, %p2504_p1 }
  0x84   : > { %2514 = shalt.err (!%p2511_p6)
}
  0x85   : > { %2230 = dma.hbm_to_vmem [thread:$0]  (!%p2830_p0), %s431_s4, 128, %s434_s29, %s2840_s21  }
  0x86   : > { %442 = sbr.rel (%p2748_p3) target bundleno = 1729 (0x6c1), region = 56  ;;  %s2903_s22 = sand.u32 (!%p2748_p3), 1, %s2621_s14  }
  0x87   : > { %s2906_s27 = sshll.u32 (!%p2748_p3), %s2903_s22, 3  ;;  %s445_s3 = scalar_lea.sflag (!%p2748_p3), [#allocation3], %s2903_s22 }
  0x88   : > { %s448_s24 = scalar_lea.vmem (!%p2748_p3), [#allocation2], %s2906_s27 }
  0x8b   : > { %2592 = dma.done.wait (%p2804_p11), %s445_s3, 128  }
  0x8c   : > { %2594 = vsyncadd (%p2804_p11), %s445_s3, 4294967168  ;;  %s453_s4 = sand.u32 1, %s2743_s19   ;;  %s457_s28 = scalar_lea.vmem [#allocation5], %s2906_s27 }
  0x8d   : > { %s454_s20 = scalar_lea.sflag [#allocation6], %s453_s4 }
  0x8e   : > { %2596 = dma.done.wait (%p2804_p11), %s454_s20, 256  }
  0x8f   : > { %2598 = vsyncadd (%p2804_p11), %s454_s20, 4294967040  ;;  %s466_s21 = scalar_lea.vmem [#allocation7], %s2906_s27  ;;  %p3189_p3 = scmp.eq.s32.totalorder %s2743_s19, 0 }
  0x91   : > { %2600 = dma.done.wait (%p3189_p3), [#allocation9], 1024   ;;  %p3190_p0 = pmov %p3189_p3 }
  0x93   : > { %2602 = vsyncadd (%p3190_p0), [#allocation9], 4294966272  ;;  %p3191_p13 = pmov %p3190_p0 }
  0x94   : > { %p3192_p9 = pmov %p3190_p0 }
  0x95   : > { %2604 = dma.done.wait (%p3191_p13), [#allocation12], 1024  }
  0x96   : > { %2606 = vsyncadd (%p3192_p9), [#allocation12], 4294966272  ;;  %vm535_vm0 = vcmask 261120   ;;  %v2929_v0 = vld [vmem:[%s448_s24] sm:$0xff]  ;;  %v2648_v7 = vmov 0.0   ;;  %vm2649_vm1 = vmmov 0  }
  0x97   : > { %v536_v1 = vsel %vm535_vm0, %v2929_v0, 0.0  ;;  %2100 = vmatprep.subr.mxu1 %v2648_v7  ;;  %v647_v8 = vld [vmem:[#allocation10 + $0x18] sm:$0xff]  ;;  %v646_v9 = vld [vmem:[#allocation10 + $0x10] sm:$0xff]  ;;  %2089 = vmatprep.subr.mxu0 %v2648_v7  ;;  %v645_v11 = vld [vmem:[#allocation10 + $0x8] sm:$0xff]  ;;  %vm823_vm2 = vcmask 64512   ;;  %s2650_s13 = smov 120  }
  0x98   : > { %537 = vadd.xlane.f32.xlu0 %v536_v1  ;;  %2101 = vmatpush3.msra.mxu1 %v647_v8  ;;  %v569_v10 = vld [vmem:[#allocation8 + $0x18] sm:$0xff]  ;;  %v568_v12 = vld [vmem:[#allocation8 + $0x10] sm:$0xff]  ;;  %v567_v13 = vld [vmem:[#allocation8 + $0x8] sm:$0xff]  ;;  %s2651_s17 = smov 112   ;;  %s2652_s9 = smov 104  }
  0x99   : > { %2108 = vmatprep.mubr.msk.f32.mxu1 %vm2649_vm1, %v2648_v7  ;;  %2102 = vmatprep.subr.mxu1 %v2648_v7  ;;  %v644_v14 = vld [vmem:[#allocation10] sm:$0xff]  ;;  %v2021_v21 = vld [vmem:[%s3138_s7] ss:$0 sm:$0xff]  ;;  %v725_v28 = vld [vmem:[#allocation11 + $0x18] sm:$0xff]  ;;  %s2020_s29 = sshll.u32 %s2903_s22, 5  ;;  %s2049_s12 = sshll.u32 %s2629_s16, 9 }
  0x9a   : > { %2090 = vmatpush3.msra.mxu0 %v569_v10  ;;  %2103 = vmatpush3.msra.mxu1 %v646_v9  ;;  %v643_v15 = vld [vmem:[%s457_s28] sm:$0xff]  ;;  %v2022_v23 = vld [vmem:[%s3139_s8] ss:$0 sm:$0xff]  ;;  %s3014_s5 = scalar_lea.vmem [#allocation15], %s2020_s29  ;;  %s3193_s25 = sld [smem:[#allocation34_spill]] }
  0x9b   : > { %2091 = vmatprep.subr.mxu0 %v2648_v7  ;;  %2104 = vmatprep.subr.mxu1 %v2648_v7  ;;  %v566_v16 = vld [vmem:[#allocation8] sm:$0xff]  ;;  %v724_v29 = vld [vmem:[#allocation11 + $0x10] sm:$0xff]  ;;  %v723_v30 = vld [vmem:[#allocation11 + $0x8] sm:$0xff]  ;;  %s1799_s18 = sshll.u32 %s3014_s5, 4  ;;  %s1771_s24 = scalar_lea.sflag [#allocation16], %s2903_s22  ;;  %s3059_s18 = int_to_ptr.vmem [resolvable:$true] %s1799_s18 }
  0x9c   : > { %2092 = vmatpush3.msra.mxu0 %v568_v12  ;;  %2105 = vmatpush3.msra.mxu1 %v645_v11  ;;  %v722_v31 = vld [vmem:[#allocation11] sm:$0xff]  ;;  %v721_v32 = vld [vmem:[%s466_s21] sm:$0xff]  ;;  %s2515_s4 = scalar_lea.vmem %s3059_s18, 512  ;;  %p3194_p12 = scmp.ne.s32.totalorder %s3175_s11, 0 }
  0x9d   : > { %2093 = vmatprep.subr.mxu0 %v2648_v7  ;;  %2106 = vmatprep.subr.mxu1 %v2648_v7  ;;  %p2516_p11 = scmp.ne.s32.totalorder %s3059_s18, %s2515_s4  ;;  %s2653_s20 = smov [#allocation15]  }
  0x9e   : > { %2094 = vmatpush3.msra.mxu0 %v567_v13  ;;  %2107 = vmatpush3.msra.mxu1 %v644_v14  ;;  %s2519_s28 = sshll.u32 %s2653_s20, 4  ;;  %s2520_s28 = int_to_ptr.vmem [resolvable:$false] %s2519_s28 }
  0x9f   : > { %2095 = vmatprep.subr.mxu0 %v2648_v7  ;;  %2109 = vmatmul.mubr.msk.f32.vlgmr.msra.gmra.mxu1 %vm535_vm0, %v643_v15  ;;  %p2517_p2 = pnand %p2516_p11, %p3194_p12  ;;  %s2521_s21 = scalar_lea.vmem %s2520_s28, 1024 }
  0xa0   : > { %2096 = vmatpush3.msra.mxu0 %v566_v16  ;;  %2097 = vmatprep.mubr.msk.f32.mxu0 %vm2649_vm1, %v2648_v7  ;;  %s3057_s3 = scalar_lea.hbm %s3193_s25, %s2049_s12  ;;  %p2522_p10 = scmp.lt.s32.totalorder %s3059_s18, %s2520_s28 }
  0xa1   : > { %2122 = vmatprep.subr.mxu1 %v2648_v7  ;;  %2124 = vmatprep.mubr.msk.f32.mxu1 %vm2649_vm1, %v2648_v7  ;;  %p2518_p5 = pneg %p2517_p2  ;;  %p2523_p1 = scmp.lt.s32.totalorder %s2521_s21, %s2515_s4 }
  0xa2   : > { %2111 = vmatprep.subr.mxu0 %v2648_v7 }
  0xa3   : > { %p2524_p7 = por %p2523_p1, %p2522_p10 }
  0xa5   : > { %p2525_p4 = pnand %p2524_p7, %p2518_p5 }
 0x121   : > { %v538_v2 = vpop.xlane.xlu0 %537 }
 0x122   : > { %v540_v3 = vmul.f32 0.03125, %v538_v2 }
 0x124   : > { %v541_v4 = vsub.f32 %v2929_v0, %v540_v3 }
 0x126   : > { %v542_v5 = vmul.f32 %v541_v4, %v541_v4 }
 0x128   : > { %v543_v6 = vsel %vm535_vm0, %v542_v5, 0.0 }
 0x129   : > { %544 = vadd.xlane.f32.xlu0 %v543_v6 }
 0x15f   : > { %v717_v26 = vpop.f32.mrf.mxu1 }
 0x160   : > { %807 = vrot.lane.b32.xlu1 %v717_v26, %s2650_s13  ;;  %2123 = vmatpush3.xpose.msk.msra.mxu1 %vm823_vm2, %v717_v26 }
 0x161   : > { %v2110_v27 = vpop.f32.mrf.mxu1  ;;  %2127 = vmatprep.subr.mxu1 %v2648_v7 }
 0x164   : > { %809 = vrot.lane.b32.xlu1 %v717_v26, %s2651_s17 }
 0x168   : > { %811 = vrot.lane.b32.xlu1 %v717_v26, %s2652_s9 }
 0x1b2   : > { %v545_v17 = vpop.xlane.xlu0 %544 }
 0x1b3   : > { %v546_v18 = vmul.f32 0.03125, %v545_v17 }
 0x1b5   : > { %v547_v19 = vadd.f32 1e-06, %v546_v18 }
 0x1b7   : > { %2309 = vrsqrt.f32 %v547_v19 }
 0x1c4   : > { %v2310_v20 = vpop.eup %2309 }
 0x1c5   : > { %v549_v22 = vmul.f32 %v2310_v20, %v541_v4 }
 0x1c7   : > { %v557_v24 = vmul.f32 %v2021_v21, %v549_v22 }
 0x1c9   : > { %v565_v25 = vadd.f32 %v2022_v23, %v557_v24  ;;  %v1460_v24 = vld [vmem:[#allocation13] sm:$0xff] }
 0x1cb   : > { %2098 = vmatmul.mubr.msk.f32.vlgmr.msra.gmra.mxu0 %vm535_vm0, %v565_v25 }
 0x1cc   : > { %2119 = vmatprep.mubr.msk.f32.mxu0 %vm2649_vm1, %v2648_v7  ;;  %2112 = vmatpush3.msra.mxu0 %v725_v28 }
 0x1cd   : > { %2113 = vmatprep.subr.mxu0 %v2648_v7 }
 0x1ce   : > { %2114 = vmatpush3.msra.mxu0 %v724_v29  ;;  %v1461_v29 = vld [vmem:[#allocation13 + $0x8] sm:$0xff] }
 0x1cf   : > { %2115 = vmatprep.subr.mxu0 %v2648_v7 }
 0x1d0   : > { %2116 = vmatpush3.msra.mxu0 %v723_v30  ;;  %v1462_v30 = vld [vmem:[#allocation13 + $0x10] sm:$0xff] }
 0x1d1   : > { %2117 = vmatprep.subr.mxu0 %v2648_v7 }
 0x1d2   : > { %2118 = vmatpush3.msra.mxu0 %v722_v31  ;;  %v808_v33 = vpop.permute.xlu1 %807 }
 0x1d3   : > { %2132 = vmatprep.subr.mxu0 %v2648_v7  ;;  %2120 = vmatmul.mubr.msk.f32.vlgmr.msra.gmra.mxu0 %vm535_vm0, %v721_v32 }
 0x1d4   : > { %2134 = vmatprep.mubr.msk.f32.mxu0 %vm2649_vm1, %v2648_v7 }
 0x1d6   : > { %v810_v34 = vpop.permute.xlu1 %809 }
 0x1d7   : > { %2133 = vmatpush3.xpose.msk.msra.mxu0 %vm823_vm2, %v810_v34 }
 0x1d8   : > { %2142 = vmatprep.subr.mxu0 %v2648_v7 }
 0x1da   : > { %v812_v39 = vpop.permute.xlu1 %811 }
 0x28b   : > { %v639_v35 = vpop.f32.mrf.mxu0 }
 0x28c   : > { %802 = vrot.lane.b32.xlu1 %v639_v35, %s2651_s17  ;;  %800 = vrot.lane.b32.xlu0 %v639_v35, %s2650_s13 }
 0x28d   : > { %2125 = vmatmul.mubr.msk.f32.vlgmr.msra.gmra.mxu1 %vm823_vm2, %v639_v35  ;;  %v2099_v36 = vpop.f32.mrf.mxu0 }
 0x28e   : > { %2128 = vmatpush3.xpose.msk.msra.mxu1 %vm823_vm2, %v808_v33  ;;  %2129 = vmatprep.mubr.msk.f32.mxu1 %vm2649_vm1, %v2648_v7  ;;  %v1463_v33 = vld [vmem:[#allocation13 + $0x18] sm:$0xff] }
 0x28f   : > { %2137 = vmatprep.subr.mxu1 %v2648_v7 }
 0x290   : > { %804 = vrot.lane.b32.xlu1 %v639_v35, %s2652_s9 }
 0x293   : > { %v2987_v37 = vpop.f32.mrf.mxu0 }
 0x295   : > { %v2121_v38 = vpop.f32.mrf.mxu0 }
 0x2fe   : > { %v803_v40 = vpop.permute.xlu1 %802  ;;  %v801_v41 = vpop.permute.xlu0 %800 }
 0x2ff   : > { %2130 = vmatmul.mubr.msk.f32.vlgmr.msra.gmra.mxu1 %vm823_vm2, %v801_v41  ;;  %2135 = vmatmul.mubr.msk.f32.vlgmr.msra.gmra.mxu0 %vm823_vm2, %v803_v40 }
 0x300   : > { %2138 = vmatpush3.xpose.msk.msra.mxu1 %vm823_vm2, %v812_v39  ;;  %2139 = vmatprep.mubr.msk.f32.mxu1 %vm2649_vm1, %v2648_v7 }
 0x301   : > { %2143 = vmatpush3.msra.mxu0 %v2987_v37  ;;  %2144 = vmatprep.mubr.msk.f32.mxu0 %vm2649_vm1, %v2648_v7 }
 0x302   : > { %v805_v42 = vpop.permute.xlu1 %804  ;;  %2147 = vmatprep.subr.mxu1 %v2648_v7  ;;  %2152 = vmatprep.subr.mxu0 %v2648_v7 }
 0x303   : > { %2140 = vmatmul.mubr.msk.f32.vlgmr.msra.gmra.mxu1 %vm823_vm2, %v805_v42 }
 0x304   : > { %2149 = vmatprep.mubr.msk.f32.mxu1 %vm2649_vm1, %v2648_v7 }
 0x34d   : > { %v894_v43 = vpop.f32.mrf.mxu1 }
 0x34e   : > { %v1120_v44 = vsel %vm823_vm2, %v894_v43, -inf }
 0x34f   : > { %1121 = vmax.xlane.f32.xlu1 %v1120_v44  ;;  %v2126_v45 = vpop.f32.mrf.mxu1 }
 0x3bf   : > { %v968_v46 = vpop.f32.mrf.mxu1  ;;  %v1042_v47 = vpop.f32.mrf.mxu0 }
 0x3c0   : > { %v1123_v48 = vsel %vm823_vm2, %v968_v46, -inf  ;;  %v1126_v49 = vsel %vm823_vm2, %v1042_v47, -inf }
 0x3c1   : > { %1124 = vmax.xlane.f32.xlu0 %v1123_v48  ;;  %v2131_v50 = vpop.f32.mrf.mxu1  ;;  %1127 = vmax.xlane.f32.xlu1 %v1126_v49  ;;  %v2136_v51 = vpop.f32.mrf.mxu0 }
 0x3c3   : > { %v1116_v52 = vpop.f32.mrf.mxu1 }
 0x3c4   : > { %v1129_v53 = vsel %vm823_vm2, %v1116_v52, -inf }
 0x3c5   : > { %v2141_v54 = vpop.f32.mrf.mxu1  ;;  %1130 = vmax.xlane.f32.xlu1 %v1129_v53 }
 0x3d8   : > { %v1122_v55 = vpop.xlane.xlu1 %1121 }
 0x3d9   : > { %v1132_v56 = vsub.f32 %v894_v43, %v1122_v55 }
 0x3db   : > { %v1136_v57 = vmul.f32 1.442695, %v1132_v56 }
 0x3dd   : > { %2311 = vpow2.f32 %v1136_v57 }
 0x3ea   : > { %v2312_v58 = vpop.eup %2311 }
 0x3eb   : > { %v1144_v59 = vsel %vm823_vm2, %v2312_v58, 0.0 }
 0x3ec   : > { %1145 = vadd.xlane.f32.xlu0 %v1144_v59 }
 0x44a   : > { %v1125_v60 = vpop.xlane.xlu0 %1124  ;;  %v1128_v61 = vpop.xlane.xlu1 %1127 }
 0x44b   : > { %v1133_v62 = vsub.f32 %v968_v46, %v1125_v60  ;;  %v1134_v63 = vsub.f32 %v1042_v47, %v1128_v61 }
 0x44d   : > { %v1138_v1 = vmul.f32 1.442695, %v1133_v62  ;;  %v1140_v2 = vmul.f32 1.442695, %v1134_v63 }
 0x44e   : > { %v1131_v9 = vpop.xlane.xlu1 %1130 }
 0x44f   : > { %2313 = vpow2.f32 %v1138_v1  ;;  %v1135_v10 = vsub.f32 %v1116_v52, %v1131_v9 }
 0x450   : > { %2315 = vpow2.f32 %v1140_v2 }
 0x451   : > { %v1142_v11 = vmul.f32 1.442695, %v1135_v10 }
 0x45c   : > { %v2314_v3 = vpop.eup %2313 }
 0x45d   : > { %v2316_v4 = vpop.eup %2315  ;;  %v1147_v5 = vsel %vm823_vm2, %v2314_v3, 0.0 }
 0x45e   : > { %1148 = vadd.xlane.f32.xlu1 %v1147_v5  ;;  %v1150_v6 = vsel %vm823_vm2, %v2316_v4, 0.0 }
 0x45f   : > { %1151 = vadd.xlane.f32.xlu0 %v1150_v6 }
 0x46f   : > { %817 = vrot.lane.b32.xlu1 %v2987_v37, %s2651_s17 }
 0x475   : > { %v1146_v8 = vpop.xlane.xlu0 %1145  ;;  %814 = vrot.lane.b32.xlu0 %v2987_v37, %s2650_s13 }
 0x476   : > { %2317 = vrcp.f32 %v1146_v8 }
 0x477   : > { %2319 = vpow2.f32 %v1142_v11 }
 0x483   : > { %v2318_v12 = vpop.eup %2317 }
 0x484   : > { %v1160_v13 = vmul.f32 %v2318_v12, %v2312_v58  ;;  %v2320_v14 = vpop.eup %2319 }
 0x485   : > { %v1153_v15 = vsel %vm823_vm2, %v2320_v14, 0.0 }
 0x486   : > { %1164 = vst.msk [vmem:[%s3014_s5] sm:$0xff] %vm823_vm2, %v1160_v13  ;;  %2145 = vmatmul.mubr.msk.f32.vlgmr.msra.gmra.mxu0 %vm823_vm2, %v1160_v13 }
 0x487   : > { %2154 = vmatprep.mubr.msk.f32.mxu0 %vm2649_vm1, %v2648_v7 }
 0x493   : > { %1154 = vadd.xlane.f32.xlu1 %v1153_v15 }
 0x4a4   : > { %820 = vrot.lane.b32.xlu1 %v2987_v37, %s2652_s9 }
 0x4e7   : > { %v1149_v16 = vpop.xlane.xlu1 %1148 }
 0x4e8   : > { %v1152_v17 = vpop.xlane.xlu0 %1151  ;;  %2321 = vrcp.f32 %v1149_v16 }
 0x4e9   : > { %2323 = vrcp.f32 %v1152_v17 }
 0x4eb   : > { %v818_v18 = vpop.permute.xlu1 %817 }
 0x4ec   : > { %v815_v19 = vpop.permute.xlu0 %814  ;;  %2153 = vmatpush3.msra.mxu0 %v818_v18 }
 0x4ed   : > { %2148 = vmatpush3.msra.mxu1 %v815_v19  ;;  %2162 = vmatprep.subr.mxu0 %v2648_v7 }
 0x4ee   : > { %2157 = vmatprep.subr.mxu1 %v2648_v7 }
 0x4f5   : > { %v2322_v20 = vpop.eup %2321 }
 0x4f6   : > { %v2324_v21 = vpop.eup %2323  ;;  %v1161_v22 = vmul.f32 %v2322_v20, %v2314_v3 }
 0x4f7   : > { %v1162_v23 = vmul.f32 %v2324_v21, %v2316_v4 }
 0x4f8   : > { %1165 = vst.msk [vmem:[%s3014_s5 + $0x8] sm:$0xff] %vm823_vm2, %v1161_v22  ;;  %2150 = vmatmul.mubr.msk.f32.vlgmr.msra.gmra.mxu1 %vm823_vm2, %v1161_v22 }
 0x4f9   : > { %1166 = vst.msk [vmem:[%s3014_s5 + $0x10] sm:$0xff] %vm823_vm2, %v1162_v23  ;;  %2155 = vmatmul.mubr.msk.f32.vlgmr.msra.gmra.mxu0 %vm823_vm2, %v1162_v23  ;;  %2159 = vmatprep.mubr.msk.f32.mxu1 %vm2649_vm1, %v2648_v7 }
 0x4fa   : > { %2163 = vmatpush3.msra.mxu0 %v1460_v24  ;;  %2164 = vmatprep.mubr.msk.f32.mxu0 %vm2649_vm1, %v2648_v7 }
 0x4fb   : > { %2172 = vmatprep.subr.mxu0 %v2648_v7 }
 0x51c   : > { %v1155_v25 = vpop.xlane.xlu1 %1154 }
 0x51d   : > { %2325 = vrcp.f32 %v1155_v25 }
 0x520   : > { %v821_v26 = vpop.permute.xlu1 %820 }
 0x521   : > { %2158 = vmatpush3.msra.mxu1 %v821_v26 }
 0x522   : > { %2167 = vmatprep.subr.mxu1 %v2648_v7 }
 0x52a   : > { %v2326_v27 = vpop.eup %2325 }
 0x52b   : > { %v1163_v28 = vmul.f32 %v2326_v27, %v2320_v14 }
 0x52d   : > { %1167 = vst.msk [vmem:[%s3014_s5 + $0x18] sm:$0xff] %vm823_vm2, %v1163_v28  ;;  %2160 = vmatmul.mubr.msk.f32.vlgmr.msra.gmra.mxu1 %vm823_vm2, %v1163_v28 }
 0x52e   : > { %2169 = vmatprep.mubr.msk.f32.mxu1 %vm2649_vm1, %v2648_v7  ;;  %2168 = vmatpush3.msra.mxu1 %v1461_v29 }
 0x52f   : > { %2177 = vmatprep.subr.mxu1 %v2648_v7 }
 0x546   : > { %v1237_v31 = vpop.f32.mrf.mxu0 }
 0x547   : > { %2165 = vmatmul.mubr.msk.f32.vlgmr.msra.gmra.mxu0 %vm823_vm2, %v1237_v31 }
 0x548   : > { %v2146_v32 = vpop.f32.mrf.mxu0  ;;  %2173 = vmatpush3.msra.mxu0 %v1462_v30  ;;  %2174 = vmatprep.mubr.msk.f32.mxu0 %vm2649_vm1, %v2648_v7 }
 0x5b8   : > { %v1310_v34 = vpop.f32.mrf.mxu1 }
 0x5b9   : > { %v1383_v35 = vpop.f32.mrf.mxu0  ;;  %2170 = vmatmul.mubr.msk.f32.vlgmr.msra.gmra.mxu1 %vm823_vm2, %v1310_v34 }
 0x5ba   : > { %2175 = vmatmul.mubr.msk.f32.vlgmr.msra.gmra.mxu0 %vm823_vm2, %v1383_v35  ;;  %v2151_v36 = vpop.f32.mrf.mxu1  ;;  %2178 = vmatpush3.msra.mxu1 %v1463_v33 }
 0x5bb   : > { %v2156_v37 = vpop.f32.mrf.mxu0  ;;  %2179 = vmatprep.mubr.msk.f32.mxu1 %vm2649_vm1, %v2648_v7 }
 0x5ed   : > { %v1456_v38 = vpop.f32.mrf.mxu1 }
 0x5ee   : > { %2180 = vmatmul.mubr.msk.f32.vlgmr.msra.gmra.mxu1 %vm823_vm2, %v1456_v38 }
 0x5ef   : > { %v2161_v39 = vpop.f32.mrf.mxu1 }
 0x607   : > { %v1533_v40 = vpop.f32.mrf.mxu0 }
 0x609   : > { %v2166_v41 = vpop.f32.mrf.mxu0 }
 0x60a   : > { %2528 = shalt.err (!%p2525_p4)
}
 0x60b   : > { %s2529_s19 = scalar_lea.hbm %s3057_s3, 512  ;;  %s2533_s26 = scalar_lea.hbm %s3193_s25, 1024 }
 0x60c   : > { %p2530_p8 = scmp.ne.s32.totalorder %s3057_s3, %s2529_s19  ;;  %p2534_p0 = scmp.lt.s32.totalorder %s3057_s3, %s3193_s25 }
 0x60d   : > { %p2535_p13 = scmp.lt.s32.totalorder %s2533_s26, %s2529_s19 }
 0x60e   : > { %p2531_p6 = pnand %p2530_p8, %p3194_p12 }
 0x60f   : > { %p2536_p9 = por %p2535_p13, %p2534_p0 }
 0x610   : > { %p2532_p3 = pneg %p2531_p6 }
 0x612   : > { %p2537_p11 = pnand %p2536_p9, %p2532_p3 }
 0x614   : > { %2540 = shalt.err (!%p2537_p11)
}
 0x615   : > { %s2654_s9 = smov 128   ;;  %s2655_s29 = smov 8   ;;  %v1756_v46 = vsel %vm535_vm0, %v1533_v40, 0.0 }
 0x616   : > { %2205 = dma.vmem_to_hbm [thread:$0]  (%p3194_p12), %s3059_s18, 512, %s3057_s3, %s1771_s24, %s2654_s9, %s2654_s9, %s2655_s29  }
 0x617   : > { %s2044_s5 = sshll.u32 %s2629_s16, 7  ;;  %s526_s12 = scalar_lea.vmem [#allocation14], %s2906_s27 }
 0x618   : > { %s1785_s18 = sshll.u32 %s526_s12, 4  ;;  %s3195_s3 = sld [smem:[#allocation33_spill]]  ;;  %s1786_s18 = int_to_ptr.vmem [resolvable:$true] %s1785_s18 }
 0x619   : > { %s1766_s4 = scalar_lea.sflag [#allocation4], %s2903_s22  ;;  %s2541_s20 = scalar_lea.vmem %s1786_s18, 128 }
 0x61a   : > { %p2542_p2 = scmp.ne.s32.totalorder %s1786_s18, %s2541_s20  ;;  %s2656_s16 = smov [#allocation14]  }
 0x61b   : > { %s2545_s27 = sshll.u32 %s2656_s16, 4  ;;  %s2546_s27 = int_to_ptr.vmem [resolvable:$false] %s2545_s27 }
 0x61c   : > { %p2543_p5 = pnand %p2542_p2, %p3194_p12  ;;  %s2547_s28 = scalar_lea.vmem %s2546_s27, 256 }
 0x61d   : > { %p2548_p1 = scmp.lt.s32.totalorder %s1786_s18, %s2546_s27  ;;  %p2549_p7 = scmp.lt.s32.totalorder %s2547_s28, %s2541_s20 }
 0x61e   : > { %s1783_s24 = scalar_lea.hbm %s3195_s3, %s2044_s5  ;;  %p2544_p10 = pneg %p2543_p5 }
 0x61f   : > { %p2550_p4 = por %p2549_p7, %p2548_p1 }
 0x621   : > { %p2551_p8 = pnand %p2550_p4, %p2544_p10 }
 0x679   : > { %v1606_v7 = vpop.f32.mrf.mxu1 }
 0x67a   : > { %v1679_v42 = vpop.f32.mrf.mxu0  ;;  %v1757_v45 = vsel %vm535_vm0, %v1606_v7, 0.0 }
 0x67b   : > { %v2171_v43 = vpop.f32.mrf.mxu1  ;;  %v1758_v47 = vadd.f32 %v1757_v45, %v1756_v46  ;;  %v1759_v48 = vsel %vm535_vm0, %v1679_v42, 0.0 }
 0x67c   : > { %v2176_v44 = vpop.f32.mrf.mxu0 }
 0x67d   : > { %v1760_v49 = vadd.f32 %v1759_v48, %v1758_v47 }
 0x6ae   : > { %v1752_v50 = vpop.f32.mrf.mxu1 }
 0x6af   : > { %v1761_v51 = vsel %vm535_vm0, %v1752_v50, 0.0 }
 0x6b0   : > { %v1762_v52 = vadd.f32 %v1761_v51, %v1760_v49  ;;  %v2181_v53 = vpop.f32.mrf.mxu1 }
 0x6b2   : > { %v1763_v54 = vadd.f32 %v1762_v52, %v2929_v0 }
 0x6b4   : > { %1764 = vst.msk [vmem:[%s526_s12] sm:$0xff] %vm535_vm0, %v1763_v54 }
 0x6b5   : > { %2554 = shalt.err (!%p2551_p8)
}
 0x6b6   : > { %s2555_s21 = scalar_lea.hbm %s1783_s24, 128  ;;  %s2559_s30 = scalar_lea.hbm %s3195_s3, 256 }
 0x6b7   : > { %p2556_p6 = scmp.ne.s32.totalorder %s1783_s24, %s2555_s21  ;;  %p2560_p13 = scmp.lt.s32.totalorder %s1783_s24, %s3195_s3 }
 0x6b8   : > { %p2561_p9 = scmp.lt.s32.totalorder %s2559_s30, %s2555_s21 }
 0x6b9   : > { %p2557_p3 = pnand %p2556_p6, %p3194_p12 }
 0x6ba   : > { %p2562_p11 = por %p2561_p9, %p2560_p13 }
 0x6bb   : > { %p2558_p0 = pneg %p2557_p3 }
 0x6bd   : > { %p2563_p2 = pnand %p2562_p11, %p2558_p0 }
 0x6bf   : > { %2566 = shalt.err (!%p2563_p2)
}
 0x6c0   : > { %2204 = dma.vmem_to_hbm [thread:$0]  (%p3194_p12), %s1786_s18, 128, %s1783_s24, %s1766_s4  }
 0x6c1 PF: > { %s3196_s13 = sld [smem:[#allocation23_spill]] }
 0x6c2   : > { %s3197_s17 = sld [smem:[#allocation28_spill]] }
 0x6c3   : > { %s3198_s9 = sld [smem:[#allocation25_spill]] }
 0x6c7   : > { %s1814_s29 = sand.u32 1, %s3196_s13  }
 0x6c8   : > { %p3199_p5 = scmp.ne.s32.totalorder %s3197_s17, 0  ;;  %s1815_s5 = scalar_lea.sflag [#allocation4], %s1814_s29 }
 0x6c9   : > { %p3200_p10 = scmp.ge.s32.totalorder %s3198_s9, 2 }
 0x6cb   : > { %p2232_p1 = pnand %p3200_p10, %p3199_p5 }
 0x6cd   : > { %p2233_p7 = pneg %p2232_p1 }
 0x6cf   : > { %2608 = dma.done.wait (%p2233_p7), %s1815_s5, 128  }
 0x6d0   : > { %2610 = vsyncadd (%p2233_p7), %s1815_s5, 4294967168  ;;  %s1824_s12 = scalar_lea.sflag [#allocation16], %s1814_s29 }
 0x6d1   : > { %2612 = dma.done.wait (%p2233_p7), %s1824_s12, 512  }
 0x6d2   : > { %2614 = vsyncadd (%p2233_p7), %s1824_s12, 4294966784  ;;  %s35_s18 = sadd.s32 1, %s3198_s9   ;;  %s3201_s11 = sld [smem:[#allocation27_spill]] }
 0x6d3   : > { %p32_p4 = scmp.ge.s32.totalorder %s35_s18, 4   ;;  %s3202_s16 = sld [smem:[#allocation24_spill]] }
 0x6d4   : > { %s3203_s17 = sld [smem:[#allocation26_spill]]  ;;  %s3204_s13 = smov %s2621_s14 }
 0x6d5   : > { %s3205_s14 = smov %s2625_s15  ;;  %34 = sbr.rel (!%p32_p4) target bundleno = 19 (0x13), region = 158 }
 0x6d8   : > { %s3206_s15 = smov %s3201_s11 }
 0x6da   :  { %1829 = vsyncpa [#allocation3], 1 }
 0x6db   :  { %1831 = vsyncpa [#allocation3 + $0x1], 1 }
 0x6dc   :  { %1832 = vsyncpa [#allocation6], 1 }
 0x6dd   :  { %1834 = vsyncpa [#allocation6 + $0x1], 1 }
 0x6de   :  { %1835 = vsyncpa [#allocation9], 1 }
 0x6df   :  { %1836 = vsyncpa [#allocation12], 1 }
 0x6e0   :  { %1837 = vsyncpa [#allocation4], 1 }
 0x6e1   :  { %1839 = vsyncpa [#allocation4 + $0x1], 1 }
 0x6e2   :  { %1840 = vsyncpa [#allocation16], 1 }
 0x6e3   :  { %1842 = vsyncpa [#allocation16 + $0x1], 1 }

</bundles_post_ra>
